<compile_context>
chip_gen: v7x
topology: tpu7x:2x2x1
jax: 0.10.0
libtpu: 0.0.40
codegen_flags: <defaults>
</compile_context>

<pallas_src>
import jax
import jax.numpy as jnp
from jax.experimental import pallas as pl
from jax.experimental.pallas import tpu as pltpu

BN_EPS = 1e-5
LANE = 128
SUBLANE = 8
MAX_TILE_N = 2048                      # rows per batch tile (cap)
VMEM_LIMIT = 32 * 1024 * 1024          # safe on v5e/v6e (128 MiB) and v7x (64 MiB)


def _round_up(a, b):
    return (a + b - 1) // b * b


def _elu(v):
    # ELU(alpha=1): v if v > 0 else exp(v) - 1   (f32 VPU/EUP)
    return jnp.where(v > 0, v, jnp.exp(v) - 1.0)


# ----------------------------------------------------------------------------
# Parameter prep (one-time): transpose (out,in)->(in,out), pad features to 128
# lanes, cast matmul weights to bf16, drop BN-cancelled biases b2/b4.
# ----------------------------------------------------------------------------
def prepare_params(params):
    output_dims = params["w1"].shape[1]
    mid_dims = params["w2"].shape[0]
    feat_dims = params["w4"].shape[0]
    in_p = _round_up(output_dims, LANE)
    mid_p = _round_up(mid_dims, LANE)
    feat_p = _round_up(feat_dims, LANE)

    def wpad(w, rows, cols):
        wt = w.T.astype(jnp.float32)
        wt = jnp.pad(wt, ((0, rows - wt.shape[0]), (0, cols - wt.shape[1])))
        return wt.astype(jnp.bfloat16)

    def vpad(v, cols):
        return jnp.pad(v.astype(jnp.float32), (0, cols - v.shape[0]))[None, :]

    return {
        "output_dims": output_dims, "mid_dims": mid_dims, "feat_dims": feat_dims,
        "in_p": in_p, "mid_p": mid_p, "feat_p": feat_p,
        "w1": wpad(params["w1"], in_p, mid_p),
        "b1": vpad(params["b1"], mid_p),
        "w2": wpad(params["w2"], mid_p, mid_p),
        "g2": vpad(params["g2"], mid_p),
        "be2": vpad(params["be2"], mid_p),
        "w3": wpad(params["w3"], mid_p, feat_p),
        "b3": vpad(params["b3"], feat_p),
        "w4": wpad(params["w4"], feat_p, feat_p),
        "g4": vpad(params["g4"], feat_p),
        "be4": vpad(params["be4"], feat_p),
    }


# ----------------------------------------------------------------------------
# Fused forward pass (3 pallas_calls, tiled over the batch).
# ----------------------------------------------------------------------------
def forward_layer(x, p):
    n, d = x.shape
    assert d == p["output_dims"]
    in_p, mid_p, feat_p = p["in_p"], p["mid_p"], p["feat_p"]

    n8 = _round_up(max(n, SUBLANE), SUBLANE)
    tile_n = min(MAX_TILE_N, n8)
    n_pad = _round_up(n8, tile_n)
    n_tiles = n_pad // tile_n
    need_mask = n_pad != n           # padded rows must not pollute BN stats
    inv_n = 1.0 / float(n)

    x_p = jnp.pad(x.astype(jnp.float32), ((0, n_pad - n), (0, in_p - d)))

    def _masked(z, i):
        if not need_mask:
            return z
        rows = i * tile_n + jax.lax.broadcasted_iota(jnp.int32, (tile_n, 1), 0)
        return jnp.where(rows < n, z, 0.0)

    def _accum_stats(s_ref, z, i):
        # one-pass stats: row 0 = sum, row 1 = sum of squares
        zm = _masked(z, i)
        s_ref[...] += jnp.concatenate(
            [jnp.sum(zm, axis=0, keepdims=True),
             jnp.sum(zm * zm, axis=0, keepdims=True)], axis=0)

    def _scale_shift(s, g, be):
        mean = s[0:1, :] * inv_n
        var = jnp.maximum(s[1:2, :] * inv_n - mean * mean, 0.0)
        scale = g * jax.lax.rsqrt(var + BN_EPS)
        return scale, be - mean * scale

    cp_arb = pltpu.CompilerParams(dimension_semantics=("arbitrary",),
                                  vmem_limit_bytes=VMEM_LIMIT)
    cp_par = pltpu.CompilerParams(dimension_semantics=("parallel",),
                                  vmem_limit_bytes=VMEM_LIMIT)

    # ---- stage 1: Linear1 + ELU + Linear2 (no bias); accumulate BN2 stats ----
    def stage1_kernel(x_ref, w1_ref, b1_ref, w2_ref, z2_ref, s2_ref):
        i = pl.program_id(0)

        @pl.when(i == 0)
        def _():
            s2_ref[...] = jnp.zeros_like(s2_ref)

        h1 = _elu(jnp.dot(x_ref[...].astype(jnp.bfloat16), w1_ref[...],
                          preferred_element_type=jnp.float32) + b1_ref[...])
        z2 = jnp.dot(h1.astype(jnp.bfloat16), w2_ref[...],
                     preferred_element_type=jnp.float32)
        z2_ref[...] = z2
        _accum_stats(s2_ref, z2, i)

    z2, s2 = pl.pallas_call(
        stage1_kernel,
        out_shape=(jax.ShapeDtypeStruct((n_pad, mid_p), jnp.float32),
                   jax.ShapeDtypeStruct((2, mid_p), jnp.float32)),
        grid=(n_tiles,),
        in_specs=[
            pl.BlockSpec((tile_n, in_p), lambda i: (i, 0)),
            pl.BlockSpec((in_p, mid_p), lambda i: (0, 0)),
            pl.BlockSpec((1, mid_p), lambda i: (0, 0)),
            pl.BlockSpec((mid_p, mid_p), lambda i: (0, 0)),
        ],
        out_specs=(
            pl.BlockSpec((tile_n, mid_p), lambda i: (i, 0)),
            pl.BlockSpec((2, mid_p), lambda i: (0, 0)),
        ),
        compiler_params=cp_arb,
    )(x_p, p["w1"], p["b1"], p["w2"])

    # ---- stage 2: BN2 + ELU + Linear3 + ELU + Linear4 (no bias); BN4 stats ----
    def stage2_kernel(z2_ref, s2_ref, g2_ref, be2_ref, w3_ref, b3_ref, w4_ref,
                      z4_ref, s4_ref):
        i = pl.program_id(0)

        @pl.when(i == 0)
        def _():
            s4_ref[...] = jnp.zeros_like(s4_ref)

        scale2, shift2 = _scale_shift(s2_ref[...], g2_ref[...], be2_ref[...])
        h2 = _elu(z2_ref[...] * scale2 + shift2)
        h3 = _elu(jnp.dot(h2.astype(jnp.bfloat16), w3_ref[...],
                          preferred_element_type=jnp.float32) + b3_ref[...])
        z4 = jnp.dot(h3.astype(jnp.bfloat16), w4_ref[...],
                     preferred_element_type=jnp.float32)
        z4_ref[...] = z4
        _accum_stats(s4_ref, z4, i)

    z4, s4 = pl.pallas_call(
        stage2_kernel,
        out_shape=(jax.ShapeDtypeStruct((n_pad, feat_p), jnp.float32),
                   jax.ShapeDtypeStruct((2, feat_p), jnp.float32)),
        grid=(n_tiles,),
        in_specs=[
            pl.BlockSpec((tile_n, mid_p), lambda i: (i, 0)),
            pl.BlockSpec((2, mid_p), lambda i: (0, 0)),
            pl.BlockSpec((1, mid_p), lambda i: (0, 0)),
            pl.BlockSpec((1, mid_p), lambda i: (0, 0)),
            pl.BlockSpec((mid_p, feat_p), lambda i: (0, 0)),
            pl.BlockSpec((1, feat_p), lambda i: (0, 0)),
            pl.BlockSpec((feat_p, feat_p), lambda i: (0, 0)),
        ],
        out_specs=(
            pl.BlockSpec((tile_n, feat_p), lambda i: (i, 0)),
            pl.BlockSpec((2, feat_p), lambda i: (0, 0)),
        ),
        compiler_params=cp_arb,
    )(z2, s2, p["g2"], p["be2"], p["w3"], p["b3"], p["w4"])

    # ---- stage 3: BN4 + ELU (fully parallel over batch tiles) ----
    def stage3_kernel(z4_ref, s4_ref, g4_ref, be4_ref, o_ref):
        scale4, shift4 = _scale_shift(s4_ref[...], g4_ref[...], be4_ref[...])
        o_ref[...] = _elu(z4_ref[...] * scale4 + shift4)

    out_p = pl.pallas_call(
        stage3_kernel,
        out_shape=jax.ShapeDtypeStruct((n_pad, feat_p), jnp.float32),
        grid=(n_tiles,),
        in_specs=[
            pl.BlockSpec((tile_n, feat_p), lambda i: (i, 0)),
            pl.BlockSpec((2, feat_p), lambda i: (0, 0)),
            pl.BlockSpec((1, feat_p), lambda i: (0, 0)),
            pl.BlockSpec((1, feat_p), lambda i: (0, 0)),
        ],
        out_specs=pl.BlockSpec((tile_n, feat_p), lambda i: (i, 0)),
        compiler_params=cp_par,
    )(z4, s4, p["g4"], p["be4"])

    return out_p[:n, :p["feat_dims"]]


# ----------------------------------------------------------------------------
# Deterministic synthetic parameters (PyTorch Linear layout: (out, in)).
# ----------------------------------------------------------------------------
def init_params(key, output_dims, mid_dims, feat_dims):
    ks = jax.random.split(key, 4)

    def lin(k, out_d, in_d):
        kw, kb = jax.random.split(k)
        bound = 1.0 / jnp.sqrt(in_d)
        w = jax.random.uniform(kw, (out_d, in_d), jnp.float32, -bound, bound)
        b = jax.random.uniform(kb, (out_d,), jnp.float32, -bound, bound)
        return w, b

    w1, b1 = lin(ks[0], mid_dims, output_dims)
    w2, b2 = lin(ks[1], mid_dims, mid_dims)
    w3, b3 = lin(ks[2], feat_dims, mid_dims)
    w4, b4 = lin(ks[3], feat_dims, feat_dims)
    return {
        "w1": w1, "b1": b1,
        "w2": w2, "b2": b2,
        "g2": jnp.ones((mid_dims,), jnp.float32),
        "be2": jnp.zeros((mid_dims,), jnp.float32),
        "w3": w3, "b3": b3,
        "w4": w4, "b4": b4,
        "g4": jnp.ones((feat_dims,), jnp.float32),
        "be4": jnp.zeros((feat_dims,), jnp.float32),
    }


# ----------------------------------------------------------------------------
# Pure-JAX reference mirroring the torch Sequential (training-mode BN).
# matmul_dtype lets us build a bf16-MXU-matched reference for tight checking.
# ----------------------------------------------------------------------------
def _bn_train_ref(v, gamma, beta):
    mean = jnp.mean(v, axis=0, keepdims=True)
    var = jnp.mean((v - mean) ** 2, axis=0, keepdims=True)
    return (v - mean) * jax.lax.rsqrt(var + BN_EPS) * gamma + beta


def forward_layer_ref(x, p, matmul_dtype=jnp.float32):
    def mm(a, w):
        return jnp.dot(a.astype(matmul_dtype), w.T.astype(matmul_dtype),
                       preferred_element_type=jnp.float32)

    h = _elu(mm(x, p["w1"]) + p["b1"])
    h = mm(h, p["w2"]) + p["b2"]
    h = _elu(_bn_train_ref(h, p["g2"], p["be2"]))
    h = _elu(mm(h, p["w3"]) + p["b3"])
    h = mm(h, p["w4"]) + p["b4"]
    return _elu(_bn_train_ref(h, p["g4"], p["be4"]))


if __name__ == "__main__":
    output_dims, mid_dims, feat_dims = 16, 32, 16
    batch = 8

    key = jax.random.PRNGKey(0)
    k_x, k_p = jax.random.split(key)
    x = jax.random.normal(k_x, (batch, output_dims), jnp.float32)
    params = init_params(k_p, output_dims, mid_dims, feat_dims)

    prepped = prepare_params(params)          # one-time weight prep (hoisted)
    out = forward_layer(x, prepped)
    out = jax.block_until_ready(out)

    assert out.shape == (batch, feat_dims)

    # Tight check against a reference using the same bf16 matmul inputs.
    ref_bf16 = forward_layer_ref(x, params, matmul_dtype=jnp.bfloat16)
    assert jnp.allclose(out, ref_bf16, atol=2e-3, rtol=2e-3), float(
        jnp.max(jnp.abs(out - ref_bf16)))

    # Loose sanity check against the pure-f32 torch-equivalent reference
    # (difference is bf16 matmul rounding only).
    ref_f32 = forward_layer_ref(x, params, matmul_dtype=jnp.float32)
    assert float(jnp.max(jnp.abs(out - ref_f32))) < 0.2

    print("KERNEL_OK")
</pallas_src>

<mosaic_0001>
module attributes {stable_mosaic.version = 11 : i64} {
  func.func @stage1_kernel(%arg0: i32, %arg1: memref<8x128xf32, #tpu.memory_space<vmem>>, %arg2: memref<128x128xbf16, #tpu.memory_space<vmem>>, %arg3: memref<1x128xf32, #tpu.memory_space<vmem>>, %arg4: memref<128x128xbf16, #tpu.memory_space<vmem>>, %arg5: memref<8x128xf32, #tpu.memory_space<vmem>>, %arg6: memref<2x128xf32, #tpu.memory_space<vmem>>) attributes {dimension_semantics = [#tpu.dimension_semantics<arbitrary>], iteration_bounds = array<i64: 1>, scalar_prefetch = 0 : i64, scratch_operands = 0 : i64, tpu.core_type = #tpu.core_type<tc>, window_params = [{transform_indices = @transform_0, window_bounds = array<i64: 8, 128>}, {pipeline_mode = #tpu.pipeline_mode<synchronous>, transform_indices = @transform_1, window_bounds = array<i64: 128, 128>}, {pipeline_mode = #tpu.pipeline_mode<synchronous>, transform_indices = @transform_2, window_bounds = array<i64: 1, 128>}, {pipeline_mode = #tpu.pipeline_mode<synchronous>, transform_indices = @transform_3, window_bounds = array<i64: 128, 128>}, {transform_indices = @transform_4, window_bounds = array<i64: 8, 128>}, {pipeline_mode = #tpu.pipeline_mode<synchronous>, transform_indices = @transform_5, window_bounds = array<i64: 2, 128>}]} {
    %c0_i32 = arith.constant 0 : i32
    %0 = arith.cmpi eq, %arg0, %c0_i32 : i32
    %1 = arith.extui %0 : i1 to i32
    %c0_i32_0 = arith.constant 0 : i32
    %2 = arith.cmpi ne, %1, %c0_i32_0 : i32
    scf.if %2 {
      %cst_19 = arith.constant 0.000000e+00 : f32
      %29 = vector.broadcast %cst_19 : f32 to vector<2x128xf32>
      %c0_20 = arith.constant 0 : index
      %c0_21 = arith.constant 0 : index
      %30 = vector.load %arg6[%c0_20, %c0_21] : memref<2x128xf32, #tpu.memory_space<vmem>>, vector<2x128xf32>
      tpu.vector_store %arg6[%c0_20, %c0_21], %29 {strides = array<i32>} : memref<2x128xf32, #tpu.memory_space<vmem>>, vector<2x128xf32>,
    } else {
    }
    %c0 = arith.constant 0 : index
    %c0_1 = arith.constant 0 : index
    %3 = vector.load %arg1[%c0, %c0_1] : memref<8x128xf32, #tpu.memory_space<vmem>>, vector<8x128xf32>
    %4 = arith.truncf %3 : vector<8x128xf32> to vector<8x128xbf16>
    %c0_2 = arith.constant 0 : index
    %c0_3 = arith.constant 0 : index
    %5 = vector.load %arg2[%c0_2, %c0_3] : memref<128x128xbf16, #tpu.memory_space<vmem>>, vector<128x128xbf16>
    %cst = arith.constant dense<0.000000e+00> : vector<8x128xf32>
    %6 = tpu.matmul %4, %5, %cst {dimension_numbers = #tpu.dot_dimension_numbers<[1], [0], [0], [1], [0, 0, 1, 1], [], []>} : vector<8x128xbf16>, vector<128x128xbf16>, vector<8x128xf32> -> vector<8x128xf32>
    %c0_4 = arith.constant 0 : index
    %c0_5 = arith.constant 0 : index
    %7 = vector.load %arg3[%c0_4, %c0_5] : memref<1x128xf32, #tpu.memory_space<vmem>>, vector<1x128xf32>
    %8 = vector.broadcast %7 : vector<1x128xf32> to vector<8x128xf32>
    %9 = arith.addf %6, %8 : vector<8x128xf32>
    %cst_6 = arith.constant 0.000000e+00 : f32
    %10 = vector.broadcast %cst_6 : f32 to vector<8x128xf32>
    %11 = arith.cmpf ogt, %9, %10 : vector<8x128xf32>
    %12 = math.exp %9 : vector<8x128xf32>
    %cst_7 = arith.constant 1.000000e+00 : f32
    %13 = vector.broadcast %cst_7 : f32 to vector<8x128xf32>
    %14 = arith.subf %12, %13 : vector<8x128xf32>
    %15 = arith.select %11, %9, %14 : vector<8x128xi1>, vector<8x128xf32>
    %16 = arith.truncf %15 : vector<8x128xf32> to vector<8x128xbf16>
    %c0_8 = arith.constant 0 : index
    %c0_9 = arith.constant 0 : index
    %17 = vector.load %arg4[%c0_8, %c0_9] : memref<128x128xbf16, #tpu.memory_space<vmem>>, vector<128x128xbf16>
    %cst_10 = arith.constant dense<0.000000e+00> : vector<8x128xf32>
    %18 = tpu.matmul %16, %17, %cst_10 {dimension_numbers = #tpu.dot_dimension_numbers<[1], [0], [0], [1], [0, 0, 1, 1], [], []>} : vector<8x128xbf16>, vector<128x128xbf16>, vector<8x128xf32> -> vector<8x128xf32>
    %c0_11 = arith.constant 0 : index
    %c0_12 = arith.constant 0 : index
    %19 = vector.load %arg5[%c0_11, %c0_12] : memref<8x128xf32, #tpu.memory_space<vmem>>, vector<8x128xf32>
    tpu.vector_store %arg5[%c0_11, %c0_12], %18 {strides = array<i32>} : memref<8x128xf32, #tpu.memory_space<vmem>>, vector<8x128xf32>,
    %c0_13 = arith.constant 0 : index
    %c0_14 = arith.constant 0 : index
    %20 = vector.load %arg6[%c0_13, %c0_14] : memref<2x128xf32, #tpu.memory_space<vmem>>, vector<2x128xf32>
    %cst_15 = arith.constant dense<0.000000e+00> : vector<128xf32>
    %21 = vector.multi_reduction <add>, %18, %cst_15 [0] : vector<8x128xf32> to vector<128xf32>
    %22 = vector.shape_cast %21 : vector<128xf32> to vector<1x128xf32>
    %23 = arith.mulf %18, %18 : vector<8x128xf32>
    %cst_16 = arith.constant dense<0.000000e+00> : vector<128xf32>
    %24 = vector.multi_reduction <add>, %23, %cst_16 [0] : vector<8x128xf32> to vector<128xf32>
    %25 = vector.shape_cast %24 : vector<128xf32> to vector<1x128xf32>
    %26 = tpu.concatenate %22, %25 in 0 : vector<1x128xf32>, vector<1x128xf32> -> vector<2x128xf32>
    %27 = arith.addf %20, %26 : vector<2x128xf32>
    %c0_17 = arith.constant 0 : index
    %c0_18 = arith.constant 0 : index
    %28 = vector.load %arg6[%c0_17, %c0_18] : memref<2x128xf32, #tpu.memory_space<vmem>>, vector<2x128xf32>
    tpu.vector_store %arg6[%c0_17, %c0_18], %27 {strides = array<i32>} : memref<2x128xf32, #tpu.memory_space<vmem>>, vector<2x128xf32>,
    return
  }
  func.func @transform_0(%arg0: i32) -> (i32, i32) {
    %c0_i32 = arith.constant 0 : i32
    %c0_i32_0 = arith.constant 0 : i32
    return %arg0, %c0_i32 : i32, i32
  }
  func.func @transform_1(%arg0: i32) -> (i32, i32) {
    %c0_i32 = arith.constant 0 : i32
    %c0_i32_0 = arith.constant 0 : i32
    %c0_i32_1 = arith.constant 0 : i32
    return %c0_i32, %c0_i32_0 : i32, i32
  }
  func.func @transform_2(%arg0: i32) -> (i32, i32) {
    %c0_i32 = arith.constant 0 : i32
    %c0_i32_0 = arith.constant 0 : i32
    %c0_i32_1 = arith.constant 0 : i32
    return %c0_i32, %c0_i32_0 : i32, i32
  }
  func.func @transform_3(%arg0: i32) -> (i32, i32) {
    %c0_i32 = arith.constant 0 : i32
    %c0_i32_0 = arith.constant 0 : i32
    %c0_i32_1 = arith.constant 0 : i32
    return %c0_i32, %c0_i32_0 : i32, i32
  }
  func.func @transform_4(%arg0: i32) -> (i32, i32) {
    %c0_i32 = arith.constant 0 : i32
    %c0_i32_0 = arith.constant 0 : i32
    return %arg0, %c0_i32 : i32, i32
  }
  func.func @transform_5(%arg0: i32) -> (i32, i32) {
    %c0_i32 = arith.constant 0 : i32
    %c0_i32_0 = arith.constant 0 : i32
    %c0_i32_1 = arith.constant 0 : i32
    return %c0_i32, %c0_i32_0 : i32, i32
  }
}

</mosaic_0001>

<bundles_post_ra>
// kernel: tpu_custom_call.1
= control target key start
LH: loop header
LB: loop body
LE: loop exit
PB: predicated region body
PF: predicated region fallthrough
CT: control target
= control target key end

     0   :  { %11 = vsyncpa [#allocation3], 0  ;;  %s667_s0 = inlined_call_operand.hbm [shape: f32[8,128], index: 0, kind: input, shape index: {}]   ;;  %s668_s1 = inlined_call_operand.hbm [shape: bf16[128,128], index: 1, kind: input, shape index: {}]   ;;  %s669_s2 = inlined_call_operand.vmem [shape: f32[1,128], index: 2, kind: input, shape index: {}]   ;;  %s670_s3 = inlined_call_operand.hbm [shape: bf16[128,128], index: 3, kind: input, shape index: {}]   ;;  %s671_s4 = inlined_call_operand.hbm [shape: f32[8,128], index: 4, kind: output, shape index: {0}]   ;;  %s672_s5 = inlined_call_operand.hbm [shape: f32[2,128], index: 5, kind: output, shape index: {1}]  }
   0x1   :  { %12 = vsyncpa [#allocation6], 0 }
   0x2   :  { %13 = vsyncpa [#allocation4], 0 }
   0x3   :  { %14 = vsyncpa [#allocation10], 0  ;;  %s559_s18 = smov [#allocation5]   ;;  %s441_s22 = scalar_lea.hbm %s668_s1, 1024 }
   0x4   :  { %s30_s19 = sshll.u32 %s559_s18, 4  ;;  %p442_p0 = scmp.ne.s32.totalorder %s668_s1, %s441_s22  ;;  %s31_s19 = int_to_ptr.vmem [resolvable:$true] %s30_s19 }
   0x5   :  { %p445_p1 = scmp.lt.u32.totalorder %s441_s22, %s668_s1 }
   0x7   :  { %p447_p2 = pnand %p445_p1, %p442_p0 }
   0x9   :  { %450 = shalt.err (!%p447_p2)
}
   0xa   :  { %s451_s27 = scalar_lea.vmem %s31_s19, 1024  ;;  %p456_p4 = scmp.lt.s32.totalorder %s31_s19, %s31_s19 }
   0xb   :  { %p452_p3 = scmp.ne.s32.totalorder %s31_s19, %s451_s27  ;;  %p457_p5 = scmp.lt.s32.totalorder %s451_s27, %s451_s27 }
   0xd   :  { %p458_p6 = por %p457_p5, %p456_p4 }
   0xf   :  { %p459_p7 = pnand %p458_p6, %p452_p3 }
  0x11   :  { %462 = shalt.err (!%p459_p7)
}
  0x12   :  { %s560_s28 = smov 64   ;;  %s561_s29 = smov 4  }
  0x13   :  { %36 = dma.hbm_to_vmem [thread:$0]  %s668_s1, 1024, %s31_s19, [#allocation6], %s560_s28, %s560_s28, %s561_s29  }
  0x14   :  { %s562_s7 = smov [#allocation2]   ;;  %s563_s9 = smov [#allocation7]  }
  0x15   :  { %s21_s8 = sshll.u32 %s562_s7, 4  ;;  %s44_s10 = sshll.u32 %s563_s9, 4  ;;  %s22_s8 = int_to_ptr.vmem [resolvable:$true] %s21_s8  ;;  %s45_s10 = int_to_ptr.vmem [resolvable:$true] %s44_s10 }
  0x16   :  { %s463_s13 = scalar_lea.hbm %s667_s0, 128 }
  0x17   :  { %p464_p8 = scmp.ne.s32.totalorder %s667_s0, %s463_s13  ;;  %p467_p9 = scmp.lt.u32.totalorder %s463_s13, %s667_s0 }
  0x19   :  { %p469_p10 = pnand %p467_p9, %p464_p8 }
  0x1b   :  { %472 = shalt.err (!%p469_p10)
}
  0x1c   :  { %s473_s1 = scalar_lea.vmem %s22_s8, 128  ;;  %p478_p12 = scmp.lt.s32.totalorder %s22_s8, %s22_s8 }
  0x1d   :  { %p474_p11 = scmp.ne.s32.totalorder %s22_s8, %s473_s1  ;;  %p479_p13 = scmp.lt.s32.totalorder %s473_s1, %s473_s1 }
  0x1f   :  { %p480_p0 = por %p479_p13, %p478_p12 }
  0x21   :  { %p481_p1 = pnand %p480_p0, %p474_p11 }
  0x23   :  { %484 = shalt.err (!%p481_p1)
}
  0x24   :  { %24 = dma.hbm_to_vmem [thread:$0]  %s667_s0, 128, %s22_s8, [#allocation3]  }
  0x25   :  { %s485_s22 = scalar_lea.hbm %s670_s3, 1024 }
  0x26   :  { %p486_p2 = scmp.ne.s32.totalorder %s670_s3, %s485_s22  ;;  %p489_p3 = scmp.lt.u32.totalorder %s485_s22, %s670_s3 }
  0x28   :  { %p491_p4 = pnand %p489_p3, %p486_p2 }
  0x2a   :  { %494 = shalt.err (!%p491_p4)
}
  0x2b   :  { %s495_s27 = scalar_lea.vmem %s45_s10, 1024  ;;  %p500_p6 = scmp.lt.s32.totalorder %s45_s10, %s45_s10 }
  0x2c   :  { %p496_p5 = scmp.ne.s32.totalorder %s45_s10, %s495_s27  ;;  %p501_p7 = scmp.lt.s32.totalorder %s495_s27, %s495_s27 }
  0x2e   :  { %p502_p8 = por %p501_p7, %p500_p6 }
  0x30   :  { %p503_p9 = pnand %p502_p8, %p496_p5 }
  0x32   :  { %506 = shalt.err (!%p503_p9)
}
  0x33   :  { %50 = dma.hbm_to_vmem [thread:$0]  %s670_s3, 1024, %s45_s10, [#allocation6], %s560_s28, %s560_s28, %s561_s29  }
  0x34   :  { %551 = dma.done.wait [#allocation3], 128  }
  0x35   :  { %552 = vsyncadd [#allocation3], 4294967168 }
  0x36   :  { %553 = dma.done.wait [#allocation6], 2048  }
  0x37   :  { %554 = vsyncadd [#allocation6], 4294965248  ;;  %v564_v0 = vmov 0.0   ;;  %vm565_vm0 = vmmov 0   ;;  %v423_v1 = vld [vmem:[#allocation5] sm:$0xff]   ;;  %v424_v2 = vld [vmem:[#allocation5 + $0x8] sm:$0xff]  }
  0x38   :  { %374 = vmatprep.subr.bf16.mxu0 %v564_v0  ;;  %65 = vst [vmem:[#allocation9] sm:$0x3] %v564_v0  ;;  %390 = vmatprep.mubr.msk.bf16.mxu0 %vm565_vm0, %v564_v0  ;;  %v425_v3 = vld [vmem:[#allocation5 + $0x10] sm:$0xff]   ;;  %v431_v4 = vld [vmem:[#allocation7] sm:$0xff]   ;;  %v426_v5 = vld [vmem:[#allocation5 + $0x18] sm:$0xff]   ;;  %s566_s29 = smov [#allocation8]  }
  0x39   :  { %394 = vmatprep.subr.bf16.mxu1 %v564_v0  ;;  %410 = vmatprep.mubr.msk.bf16.mxu1 %vm565_vm0, %v564_v0  ;;  %v432_v6 = vld [vmem:[#allocation7 + $0x8] sm:$0xff]   ;;  %v427_v7 = vld [vmem:[#allocation5 + $0x20] sm:$0xff]   ;;  %v433_v8 = vld [vmem:[#allocation7 + $0x10] sm:$0xff]   ;;  %s314_s6 = sshll.u32 %s566_s29, 4  ;;  %s315_s6 = int_to_ptr.vmem [resolvable:$true] %s314_s6 }
  0x3a   :  { %375 = vmatpush3.bf16.msra.mxu0 %v423_v1  ;;  %395 = vmatpush3.bf16.msra.mxu1 %v431_v4  ;;  %v428_v9 = vld [vmem:[#allocation5 + $0x28] sm:$0xff]   ;;  %v429_v10 = vld [vmem:[#allocation5 + $0x30] sm:$0xff]   ;;  %v430_v11 = vld [vmem:[#allocation5 + $0x38] sm:$0xff]   ;;  %p512_p11 = scmp.lt.s32.totalorder %s315_s6, %s315_s6 }
  0x3b   :  { %376 = vmatprep.subr.bf16.mxu0 %v564_v0  ;;  %396 = vmatprep.subr.bf16.mxu1 %v564_v0  ;;  %v66_v12 = vld [vmem:[#allocation2] sm:$0xff]  ;;  %v435_v15 = vld [vmem:[#allocation7 + $0x20] sm:$0xff]   ;;  %v436_v16 = vld [vmem:[#allocation7 + $0x28] sm:$0xff]  }
  0x3c   :  { %v67_v13 = vpack.c.bf16 %v66_v12, %v66_v12  ;;  %v434_v14 = vld [vmem:[#allocation7 + $0x18] sm:$0xff]   ;;  %v437_v17 = vld [vmem:[#allocation7 + $0x30] sm:$0xff]  }
  0x3d   :  { %v438_v18 = vld [vmem:[#allocation7 + $0x38] sm:$0xff]  }
  0x3e   :  { %377 = vmatpush3.bf16.msra.mxu0 %v424_v2  ;;  %397 = vmatpush3.bf16.msra.mxu1 %v432_v6  ;;  %v338_v19 = vld [vmem:[%s669_s2] ss:$0 sm:$0xff]  ;;  %s507_s2 = scalar_lea.vmem %s315_s6, 128 }
  0x3f   :  { %378 = vmatprep.subr.bf16.mxu0 %v564_v0  ;;  %398 = vmatprep.subr.bf16.mxu1 %v564_v0  ;;  %p508_p10 = scmp.ne.s32.totalorder %s315_s6, %s507_s2  ;;  %p513_p12 = scmp.lt.s32.totalorder %s507_s2, %s507_s2 }
  0x41   :  { %p514_p13 = por %p513_p12, %p512_p11 }
  0x42   :  { %379 = vmatpush3.bf16.msra.mxu0 %v425_v3  ;;  %399 = vmatpush3.bf16.msra.mxu1 %v433_v8 }
  0x43   :  { %380 = vmatprep.subr.bf16.mxu0 %v564_v0  ;;  %400 = vmatprep.subr.bf16.mxu1 %v564_v0  ;;  %p515_p0 = pnand %p514_p13, %p508_p10 }
  0x46   :  { %381 = vmatpush3.bf16.msra.mxu0 %v426_v5  ;;  %401 = vmatpush3.bf16.msra.mxu1 %v434_v14 }
  0x47   :  { %382 = vmatprep.subr.bf16.mxu0 %v564_v0  ;;  %402 = vmatprep.subr.bf16.mxu1 %v564_v0 }
  0x4a   :  { %383 = vmatpush3.bf16.msra.mxu0 %v427_v7  ;;  %403 = vmatpush3.bf16.msra.mxu1 %v435_v15 }
  0x4b   :  { %384 = vmatprep.subr.bf16.mxu0 %v564_v0  ;;  %404 = vmatprep.subr.bf16.mxu1 %v564_v0 }
  0x4e   :  { %385 = vmatpush3.bf16.msra.mxu0 %v428_v9  ;;  %405 = vmatpush3.bf16.msra.mxu1 %v436_v16 }
  0x4f   :  { %386 = vmatprep.subr.bf16.mxu0 %v564_v0  ;;  %406 = vmatprep.subr.bf16.mxu1 %v564_v0 }
  0x52   :  { %387 = vmatpush3.bf16.msra.mxu0 %v429_v10  ;;  %407 = vmatpush3.bf16.msra.mxu1 %v437_v17 }
  0x53   :  { %388 = vmatprep.subr.bf16.mxu0 %v564_v0  ;;  %408 = vmatprep.subr.bf16.mxu1 %v564_v0 }
  0x56   :  { %389 = vmatpush3.bf16.msra.mxu0 %v430_v11  ;;  %409 = vmatpush3.bf16.msra.mxu1 %v438_v18 }
  0x59   :  { %391 = vmatmul.mubr.bf16.vlgmr.msra.gmra.mrb[0].mxu0 %v67_v13 }
 0x12c   :  { %v173_v20 = vpop.f32.mrb[0].mxu0 }
 0x12d   :  { %v174_v21 = vadd.f32 %v338_v19, %v173_v20  ;;  %v392_v22 = vpop.f32.mrb[1].mxu0 }
 0x12e   :  { %v176_v23 = vpop.f32.mrb[2].mxu0 }
 0x12f   :  { %v180_v24 = vmul.f32 1.442695, %v174_v21  ;;  %v393_v25 = vpop.f32.mrb[3].mxu0  ;;  %vm179_vm1 = vcmp.gt.f32.partialorder %v174_v21, 0.0 }
 0x131   :  { %439 = vpow2.f32 %v180_v24 }
 0x13b   :  { %v440_v26 = vpop.eup %439 }
 0x13c   :  { %v347_v27 = vadd.f32 -1.0, %v440_v26 }
 0x13e   :  { %v183_v28 = vsel %vm179_vm1, %v174_v21, %v347_v27 }
 0x13f   :  { %v184_v29 = vpack.c.bf16 %v183_v28, %v183_v28 }
 0x141   :  { %411 = vmatmul.mubr.bf16.vlgmr.msra.gmra.mrb[0].mxu1 %v184_v29 }
 0x214   :  { %v283_v30 = vpop.f32.mrb[0].mxu1 }
 0x215   :  { %v291_v31 = vrot.slane %v283_v30, 4  ;;  %v297_v32 = vmul.f32 %v283_v30, %v283_v30  ;;  %289 = vst [vmem:[#allocation8] sm:$0xff] %v283_v30  ;;  %v412_v33 = vpop.f32.mrb[1].mxu1 }
 0x216   :  { %v286_v34 = vpop.f32.mrb[2].mxu1 }
 0x217   :  { %518 = shalt.err (!%p515_p0)
}
 0x218   :  { %s519_s9 = scalar_lea.hbm %s671_s4, 128 }
 0x219   :  { %p520_p1 = scmp.ne.s32.totalorder %s671_s4, %s519_s9  ;;  %p523_p2 = scmp.lt.u32.totalorder %s519_s9, %s671_s4 }
 0x21b   :  { %p525_p3 = pnand %p523_p2, %p520_p1 }
 0x21d   :  { %528 = shalt.err (!%p525_p3)
}
 0x21e   :  { %317 = dma.vmem_to_hbm [thread:$0]  %s315_s6, 128, %s671_s4, [#allocation4]   ;;  %v292_v35 = vadd.f32 %v291_v31, %v283_v30  ;;  %v298_v36 = vrot.slane %v297_v32, 4  ;;  %v413_v37 = vpop.f32.mrb[3].mxu1  ;;  %vm304_vm2 = vcmask 1040384  }
 0x21f   :  { %v290_v47 = vld [vmem:[#allocation9] sm:$0x3]  ;;  %s567_s16 = smov [#allocation9]  }
 0x220   :  { %v293_v38 = vrot.slane %v292_v35, 2  ;;  %v299_v39 = vadd.f32 %v298_v36, %v297_v32  ;;  %s324_s17 = sshll.u32 %s567_s16, 4  ;;  %s325_s17 = int_to_ptr.vmem [resolvable:$true] %s324_s17 }
 0x221   :  { %s529_s4 = scalar_lea.vmem %s325_s17, 32  ;;  %p534_p5 = scmp.lt.s32.totalorder %s325_s17, %s325_s17 }
 0x222   :  { %v294_v40 = vadd.f32 %v293_v38, %v292_v35  ;;  %v300_v41 = vrot.slane %v299_v39, 2  ;;  %p530_p4 = scmp.ne.s32.totalorder %s325_s17, %s529_s4  ;;  %p535_p6 = scmp.lt.s32.totalorder %s529_s4, %s529_s4 }
 0x224   :  { %v295_v42 = vrot.slane %v294_v40, 1  ;;  %v301_v43 = vadd.f32 %v300_v41, %v299_v39  ;;  %p536_p7 = por %p535_p6, %p534_p5 }
 0x226   :  { %v302_v44 = vrot.slane %v301_v43, 1  ;;  %v296_v45 = vadd.f32 %v295_v42, %v294_v40  ;;  %p537_p8 = pnand %p536_p7, %p530_p4 }
 0x228   :  { %v303_v46 = vadd.f32 %v302_v44, %v301_v43 }
 0x22a   :  { %v305_v48 = vsel %vm304_vm2, %v296_v45, %v303_v46 }
 0x22b   :  { %v306_v49 = vadd.f32 %v305_v48, %v290_v47 }
 0x22d   :  { %307 = vst [vmem:[#allocation9] sm:$0x3] %v306_v49 }
 0x22e   :  { %540 = shalt.err (!%p537_p8)
}
 0x22f   :  { %s541_s19 = scalar_lea.hbm %s672_s5, 32 }
 0x230   :  { %p542_p9 = scmp.ne.s32.totalorder %s672_s5, %s541_s19  ;;  %p545_p10 = scmp.lt.u32.totalorder %s541_s19, %s672_s5 }
 0x232   :  { %p547_p11 = pnand %p545_p10, %p542_p9 }
 0x234   :  { %550 = shalt.err (!%p547_p11)
}
 0x235   :  { %327 = dma.vmem_to_hbm [thread:$0]  %s325_s17, 32, %s672_s5, [#allocation10]  }
 0x236   :  { %555 = dma.done.wait [#allocation4], 128  }
 0x237   :  { %556 = vsyncadd [#allocation4], 4294967168 }
 0x238   :  { %557 = dma.done.wait [#allocation10], 32  }
 0x239   :  { %558 = vsyncadd [#allocation10], 4294967264 }
 0x23a   :  { %334 = vsyncpa [#allocation3], 1 }
 0x23b   :  { %335 = vsyncpa [#allocation6], 1 }
 0x23c   :  { %336 = vsyncpa [#allocation4], 1 }
 0x23d   :  { %337 = vsyncpa [#allocation10], 1 }

</bundles_post_ra>
